<compile_context>
chip_gen: v7x
topology: tpu7x:2x2x1
jax: 0.10.0
libtpu: 0.0.40
codegen_flags: <defaults>
</compile_context>

<pallas_src>
import functools
import math

import jax
import jax.numpy as jnp
from jax import lax
from jax.experimental import pallas as pl
from jax.experimental.pallas import tpu as pltpu


# --------------------------------------------------------------------------
# small math helpers (all f32, Mosaic-safe ops only)
# --------------------------------------------------------------------------
def _layernorm_f32(x, g, eps):
    # PyTorch LayerNorm: biased variance over last dim, affine weight only.
    m = jnp.mean(x, axis=-1, keepdims=True)
    v = jnp.mean((x - m) ** 2, axis=-1, keepdims=True)
    return (x - m) * lax.rsqrt(v + eps) * g


def _erf_poly(x):
    # Abramowitz & Stegun 7.1.26, max abs error ~1.5e-7.  Uses only exp/VPU
    # ops, so it lowers cleanly in Mosaic (erf primitive support not assumed).
    a1, a2, a3, a4, a5 = 0.254829592, -0.284496736, 1.421413741, -1.453152027, 1.061405429
    p = 0.3275911
    sgn = jnp.where(x >= 0.0, 1.0, -1.0)
    ax = jnp.abs(x)
    t = 1.0 / (1.0 + p * ax)
    poly = ((((a5 * t + a4) * t + a3) * t + a2) * t + a1) * t
    return sgn * (1.0 - poly * jnp.exp(-ax * ax))


def _gelu_exact(x):
    # nn.GELU() default: exact erf-based GELU.
    return 0.5 * x * (1.0 + _erf_poly(x * jnp.float32(1.0 / math.sqrt(2.0))))


# --------------------------------------------------------------------------
# Kernel 1: LayerNorm + fused per-head QKV projection (N = 3E matmuls).
# grid = (B, row_tiles)
# --------------------------------------------------------------------------
def _qkv_kernel(x_ref, g1_ref, wqkv_ref, q_out, k_out, v_out, *, eps):
    heads, _, three_e = wqkv_ref.shape
    E = three_e // 3

    x = x_ref[...].astype(jnp.float32)                      # (tq, C)
    g1 = g1_ref[...].astype(jnp.float32)                    # (1, C)
    xn = _layernorm_f32(x, g1, eps).astype(jnp.bfloat16)    # bf16 matmul operand

    for h in range(heads):
        qkv_h = jnp.dot(xn, wqkv_ref[h],
                        preferred_element_type=jnp.float32)  # (tq, 3E)
        q_out[h] = qkv_h[:, :E].astype(jnp.bfloat16)         # q already scaled
        k_out[h] = qkv_h[:, E:2 * E].astype(jnp.bfloat16)
        v_out[h] = qkv_h[:, 2 * E:].astype(jnp.bfloat16)


# --------------------------------------------------------------------------
# Kernel 2: flash-style causal attention + c_proj + residual.
# grid = (B, n_pairs) where n_pairs enumerates lower-triangular (q, kv) tile
# pairs (kv ascending, diagonal last) via scalar-prefetched id arrays.
# --------------------------------------------------------------------------
def _attn_kernel(qids_ref, kvids_ref, x_ref, q_ref, k_ref, v_ref, wcp_ref,
                 o_ref, m_scr, l_scr, acc_scr):
    p_idx = pl.program_id(1)
    q_idx = qids_ref[p_idx]
    kv_idx = kvids_ref[p_idx]
    heads, tile, _ = q_ref.shape

    @pl.when(kv_idx == 0)
    def _init():
        m_scr[...] = jnp.full(m_scr.shape, -1e30, jnp.float32)
        l_scr[...] = jnp.zeros(l_scr.shape, jnp.float32)
        acc_scr[...] = jnp.zeros(acc_scr.shape, jnp.float32)

    def _accumulate(masked):
        # Batched over heads: (H, tq, E) x (H, tk, E) -> (H, tq, tk).
        s = jnp.einsum('hqe,hke->hqk', q_ref[...], k_ref[...],
                       preferred_element_type=jnp.float32)
        if masked:
            # Only diagonal tiles need the causal mask (tq == tk).
            r = lax.broadcasted_iota(jnp.int32, (tile, tile), 0)
            c = lax.broadcasted_iota(jnp.int32, (tile, tile), 1)
            s = jnp.where((r >= c)[None], s, jnp.float32(-1e30))
        m_prev = m_scr[...]                                   # (H, tq, 1)
        m_new = jnp.maximum(m_prev, jnp.max(s, axis=-1, keepdims=True))
        alpha = jnp.exp(m_prev - m_new)
        p = jnp.exp(s - m_new)
        l_scr[...] = alpha * l_scr[...] + jnp.sum(p, axis=-1, keepdims=True)
        acc_scr[...] = alpha * acc_scr[...] + jnp.einsum(
            'hqk,hke->hqe', p.astype(jnp.bfloat16), v_ref[...],
            preferred_element_type=jnp.float32)
        m_scr[...] = m_new

    @pl.when(kv_idx < q_idx)       # strictly below the diagonal: no mask
    def _off_diag():
        _accumulate(masked=False)

    @pl.when(kv_idx == q_idx)      # diagonal tile: mask, finalize, c_proj, residual
    def _diag():
        _accumulate(masked=True)
        inv_l = pl.reciprocal(l_scr[...], approx=True)        # (H, tq, 1), EUP slot
        o_heads = acc_scr[...] * inv_l                        # (H, tq, E) f32
        # Concatenate heads -> (tq, C) and do ONE full-K c_proj matmul.
        o_flat = jnp.concatenate(
            [o_heads[h].astype(jnp.bfloat16) for h in range(heads)], axis=-1)
        att = jnp.dot(o_flat, wcp_ref[...], preferred_element_type=jnp.float32)
        o_ref[...] = (x_ref[...].astype(jnp.float32) + att).astype(o_ref.dtype)


# --------------------------------------------------------------------------
# Kernel 3: pre-norm MLP (LN + fc + GELU + c_proj) + residual.
# grid = (B, row_tiles)
# --------------------------------------------------------------------------
def _mlp_kernel(x_ref, g2_ref, wfc_ref, wfc2_ref, o_ref, *, eps):
    x = x_ref[...].astype(jnp.float32)                        # (tq, C)
    g2 = g2_ref[...].astype(jnp.float32)
    xn = _layernorm_f32(x, g2, eps).astype(jnp.bfloat16)
    h = jnp.dot(xn, wfc_ref[...], preferred_element_type=jnp.float32)
    h = _gelu_exact(h).astype(jnp.bfloat16)
    mlp = jnp.dot(h, wfc2_ref[...], preferred_element_type=jnp.float32)
    o_ref[...] = (x + mlp).astype(o_ref.dtype)


# --------------------------------------------------------------------------
# Wrapper
# --------------------------------------------------------------------------
def _vmem_limit_bytes():
    try:
        cap = int(pltpu.get_tpu_info().vmem_capacity_bytes)
    except Exception:
        cap = 64 * 1024 * 1024
    return max(32 * 1024 * 1024, min(int(cap * 0.75), 100 * 1024 * 1024))


def _pick_tile(T, heads, E, C, budget):
    # Largest sequence tile whose rough per-step VMEM footprint fits the budget.
    for t in (512, 256, 128):
        if T % t != 0:
            continue
        est = (2 * heads * t * t * 4            # scores + probs (f32)
               + 3 * 2 * heads * t * E * 2      # q/k/v blocks, double-buffered (bf16)
               + 2 * 2 * t * C * 4              # x + out blocks, double-buffered (f32)
               + heads * t * (E + 2) * 4        # acc / m / l scratch (f32)
               + 2 * 2 * C * C                  # W_cproj, double-buffered (bf16)
               + 2 * t * 4 * C * 4)             # MLP hidden intermediate headroom
        if est <= budget:
            return t
    for t in (128, 64, 32, 16, 8):
        if T % t == 0:
            return t
    return T   # TODO(synk): pad ragged T instead of falling back to one tile.


def self_attention_forward(x, params, *, heads, eps=1e-5):
    B, T, C = x.shape
    assert C % heads == 0
    E = C // heads
    g1, w_att, w_cp, g2, w_fc, w_fc2 = params

    vmem_limit = _vmem_limit_bytes()
    tile = _pick_tile(T, heads, E, C, budget=int(vmem_limit * 0.8))
    n_row = T // tile

    # ---- wrapper-side weight packing: head-major, bf16, q-scale folded -----
    scale = 1.0 / math.sqrt(E)

    def head_split(w):                        # (C, C) -> (H, C, E)
        return jnp.transpose(w.reshape(C, heads, E), (1, 0, 2))

    w_qkv = jnp.concatenate(
        [head_split(w_att[:, :C] * scale),
         head_split(w_att[:, C:2 * C]),
         head_split(w_att[:, 2 * C:])], axis=-1).astype(jnp.bfloat16)  # (H, C, 3E)
    w_cp_b = w_cp.astype(jnp.bfloat16)        # (C, C), input dim already (H,E)-major
    w_fc_b = w_fc.astype(jnp.bfloat16)
    w_fc2_b = w_fc2.astype(jnp.bfloat16)
    g1_f = g1.astype(jnp.float32).reshape(1, C)
    g2_f = g2.astype(jnp.float32).reshape(1, C)

    # ---- triangular (q, kv) pair enumeration (kv ascending, diagonal last) --
    pairs = [(qi, ki) for qi in range(n_row) for ki in range(qi + 1)]
    q_ids = jnp.asarray([p[0] for p in pairs], dtype=jnp.int32)
    kv_ids = jnp.asarray([p[1] for p in pairs], dtype=jnp.int32)
    n_pairs = len(pairs)

    # ---- kernel 1: LN + fused QKV projection ------------------------------
    qkv_spec = pl.BlockSpec((None, heads, tile, E), lambda b, r: (b, 0, r, 0))
    qh, kh, vh = pl.pallas_call(
        functools.partial(_qkv_kernel, eps=eps),
        out_shape=(jax.ShapeDtypeStruct((B, heads, T, E), jnp.bfloat16),
                   jax.ShapeDtypeStruct((B, heads, T, E), jnp.bfloat16),
                   jax.ShapeDtypeStruct((B, heads, T, E), jnp.bfloat16)),
        grid_spec=pltpu.PrefetchScalarGridSpec(
            num_scalar_prefetch=0,
            grid=(B, n_row),
            in_specs=[
                pl.BlockSpec((None, tile, C), lambda b, r: (b, r, 0)),
                pl.BlockSpec((1, C), lambda b, r: (0, 0)),
                pl.BlockSpec((heads, C, 3 * E), lambda b, r: (0, 0, 0)),
            ],
            out_specs=(qkv_spec, qkv_spec, qkv_spec),
        ),
        compiler_params=pltpu.CompilerParams(
            dimension_semantics=("parallel", "parallel"),
            vmem_limit_bytes=vmem_limit),
    )(x, g1_f, w_qkv)

    # ---- kernel 2: flash attention over triangular pair grid + c_proj -----
    x1 = pl.pallas_call(
        _attn_kernel,
        out_shape=jax.ShapeDtypeStruct((B, T, C), x.dtype),
        grid_spec=pltpu.PrefetchScalarGridSpec(
            num_scalar_prefetch=2,
            grid=(B, n_pairs),
            in_specs=[
                pl.BlockSpec((None, tile, C),
                             lambda b, p, qids, kvids: (b, qids[p], 0)),
                pl.BlockSpec((None, heads, tile, E),
                             lambda b, p, qids, kvids: (b, 0, qids[p], 0)),
                pl.BlockSpec((None, heads, tile, E),
                             lambda b, p, qids, kvids: (b, 0, kvids[p], 0)),
                pl.BlockSpec((None, heads, tile, E),
                             lambda b, p, qids, kvids: (b, 0, kvids[p], 0)),
                pl.BlockSpec((C, C), lambda b, p, qids, kvids: (0, 0)),
            ],
            out_specs=pl.BlockSpec((None, tile, C),
                                   lambda b, p, qids, kvids: (b, qids[p], 0)),
            scratch_shapes=[
                pltpu.VMEM((heads, tile, 1), jnp.float32),   # running max
                pltpu.VMEM((heads, tile, 1), jnp.float32),   # running sum
                pltpu.VMEM((heads, tile, E), jnp.float32),   # output accumulator
            ],
        ),
        compiler_params=pltpu.CompilerParams(
            dimension_semantics=("parallel", "arbitrary"),
            vmem_limit_bytes=vmem_limit),
    )(q_ids, kv_ids, x, qh, kh, vh, w_cp_b)

    # ---- kernel 3: MLP block (weights not resident during attention) ------
    out = pl.pallas_call(
        functools.partial(_mlp_kernel, eps=eps),
        out_shape=jax.ShapeDtypeStruct((B, T, C), x.dtype),
        grid_spec=pltpu.PrefetchScalarGridSpec(
            num_scalar_prefetch=0,
            grid=(B, n_row),
            in_specs=[
                pl.BlockSpec((None, tile, C), lambda b, r: (b, r, 0)),
                pl.BlockSpec((1, C), lambda b, r: (0, 0)),
                pl.BlockSpec((C, 4 * C), lambda b, r: (0, 0)),
                pl.BlockSpec((4 * C, C), lambda b, r: (0, 0)),
            ],
            out_specs=pl.BlockSpec((None, tile, C), lambda b, r: (b, r, 0)),
        ),
        compiler_params=pltpu.CompilerParams(
            dimension_semantics=("parallel", "parallel"),
            vmem_limit_bytes=vmem_limit),
    )(x1, g2_f, w_fc_b, w_fc2_b)
    return out


# --------------------------------------------------------------------------
# Pure-JAX f32 reference mirroring the PyTorch module (eval mode).
# --------------------------------------------------------------------------
def reference_forward(x, params, *, heads, eps=1e-5):
    g1, w_att, w_cp, g2, w_fc, w_fc2 = params
    B, T, C = x.shape
    E = C // heads

    def ln(z, g):
        m = z.mean(-1, keepdims=True)
        v = ((z - m) ** 2).mean(-1, keepdims=True)
        return (z - m) / jnp.sqrt(v + eps) * g

    xn = ln(x, g1[0])
    qkv = xn @ w_att
    q, k, v = jnp.split(qkv, 3, axis=-1)
    to_heads = lambda t: t.reshape(B, T, heads, E).transpose(0, 2, 1, 3)
    q, k, v = map(to_heads, (q, k, v))
    s = jnp.einsum('bhte,bhne->bhtn', q, k) / math.sqrt(E)
    causal = jnp.tril(jnp.ones((T, T), bool))
    s = jnp.where(causal[None, None], s, -jnp.inf)
    p = jax.nn.softmax(s, axis=-1)
    att = jnp.einsum('bhtn,bhne->bhte', p, v)
    att = att.transpose(0, 2, 1, 3).reshape(B, T, C)
    x = x + att @ w_cp
    xn2 = ln(x, g2[0])
    h = jax.nn.gelu(xn2 @ w_fc, approximate=False)
    x = x + h @ w_fc2
    return x


if __name__ == "__main__":
    def _run_case(B, T, C, H, key):
        kx, k1, k2, k3, k4, k5, k6 = jax.random.split(key, 7)
        x = jax.random.normal(kx, (B, T, C), jnp.float32)
        # Weights stored as (in, out) = PyTorch weight.T ; LayerNorm weight only.
        g1 = 1.0 + 0.1 * jax.random.normal(k1, (1, C), jnp.float32)
        w_att = 0.02 * jax.random.normal(k2, (C, 3 * C), jnp.float32)
        w_cp = 0.02 * jax.random.normal(k3, (C, C), jnp.float32)
        g2 = 1.0 + 0.1 * jax.random.normal(k4, (1, C), jnp.float32)
        w_fc = 0.02 * jax.random.normal(k5, (C, 4 * C), jnp.float32)
        w_fc2 = 0.02 * jax.random.normal(k6, (4 * C, C), jnp.float32)
        params = (g1, w_att, w_cp, g2, w_fc, w_fc2)

        out = jax.block_until_ready(self_attention_forward(x, params, heads=H))
        ref = reference_forward(x, params, heads=H)
        assert out.shape == (B, T, C)
        max_err = float(jnp.max(jnp.abs(out - ref)))
        # bf16 matmul operands + approx reciprocal vs f32 reference -> loose tol.
        assert jnp.allclose(out, ref, atol=2e-2, rtol=2e-2), \
            f"mismatch (B={B},T={T},C={C},H={H}), max |err|={max_err}"

    key = jax.random.PRNGKey(0)
    k_small, k_tiled = jax.random.split(key)
    _run_case(2, 8, 32, 4, k_small)      # small shapes (single tile / single pair)
    _run_case(1, 1024, 128, 2, k_tiled)  # exercises the triangular multi-tile path

    print("KERNEL_OK")
</pallas_src>

<mosaic_0001>
module attributes {stable_mosaic.version = 11 : i64} {
  func.func @_qkv_kernel(%arg0: i32, %arg1: i32, %arg2: memref<1x8x32xf32, #tpu.memory_space<vmem>>, %arg3: memref<1x32xf32, #tpu.memory_space<vmem>>, %arg4: memref<4x32x24xbf16, #tpu.memory_space<vmem>>, %arg5: memref<1x4x8x8xbf16, #tpu.memory_space<vmem>>, %arg6: memref<1x4x8x8xbf16, #tpu.memory_space<vmem>>, %arg7: memref<1x4x8x8xbf16, #tpu.memory_space<vmem>>) attributes {dimension_semantics = [#tpu.dimension_semantics<parallel>, #tpu.dimension_semantics<parallel>], iteration_bounds = array<i64: 2, 1>, scalar_prefetch = 0 : i64, scratch_operands = 0 : i64, tpu.core_type = #tpu.core_type<tc>, window_params = [{transform_indices = @transform_0, window_bounds = array<i64: 1, 8, 32>}, {pipeline_mode = #tpu.pipeline_mode<synchronous>, transform_indices = @transform_1, window_bounds = array<i64: 1, 32>}, {pipeline_mode = #tpu.pipeline_mode<synchronous>, transform_indices = @transform_2, window_bounds = array<i64: 4, 32, 24>}, {transform_indices = @transform_3, window_bounds = array<i64: 1, 4, 8, 8>}, {transform_indices = @transform_4, window_bounds = array<i64: 1, 4, 8, 8>}, {transform_indices = @transform_5, window_bounds = array<i64: 1, 4, 8, 8>}]} {
    %c0 = arith.constant 0 : index
    %c0_0 = arith.constant 0 : index
    %c0_1 = arith.constant 0 : index
    %0 = vector.load %arg2[%c0, %c0_0, %c0_1] : memref<1x8x32xf32, #tpu.memory_space<vmem>>, vector<1x8x32xf32>
    %1 = vector.shape_cast %0 : vector<1x8x32xf32> to vector<8x32xf32>
    %c0_2 = arith.constant 0 : index
    %c0_3 = arith.constant 0 : index
    %2 = vector.load %arg3[%c0_2, %c0_3] : memref<1x32xf32, #tpu.memory_space<vmem>>, vector<1x32xf32>
    %cst = arith.constant dense<0.000000e+00> : vector<8xf32>
    %3 = vector.multi_reduction <add>, %1, %cst [1] : vector<8x32xf32> to vector<8xf32>
    %4 = vector.shape_cast %3 : vector<8xf32> to vector<8x1xf32>
    %cst_4 = arith.constant 3.200000e+01 : f32
    %5 = vector.broadcast %cst_4 : f32 to vector<8x1xf32>
    %6 = arith.divf %4, %5 : vector<8x1xf32>
    %7 = vector.broadcast %6 : vector<8x1xf32> to vector<8x32xf32>
    %8 = arith.subf %1, %7 : vector<8x32xf32>
    %9 = arith.mulf %8, %8 : vector<8x32xf32>
    %cst_5 = arith.constant dense<0.000000e+00> : vector<8xf32>
    %10 = vector.multi_reduction <add>, %9, %cst_5 [1] : vector<8x32xf32> to vector<8xf32>
    %11 = vector.shape_cast %10 : vector<8xf32> to vector<8x1xf32>
    %cst_6 = arith.constant 3.200000e+01 : f32
    %12 = vector.broadcast %cst_6 : f32 to vector<8x1xf32>
    %13 = arith.divf %11, %12 : vector<8x1xf32>
    %14 = vector.broadcast %6 : vector<8x1xf32> to vector<8x32xf32>
    %15 = arith.subf %1, %14 : vector<8x32xf32>
    %cst_7 = arith.constant 9.99999974E-6 : f32
    %16 = vector.broadcast %cst_7 : f32 to vector<8x1xf32>
    %17 = arith.addf %13, %16 : vector<8x1xf32>
    %18 = math.rsqrt %17 : vector<8x1xf32>
    %19 = vector.broadcast %18 : vector<8x1xf32> to vector<8x32xf32>
    %20 = arith.mulf %15, %19 : vector<8x32xf32>
    %21 = vector.broadcast %2 : vector<1x32xf32> to vector<8x32xf32>
    %22 = arith.mulf %20, %21 : vector<8x32xf32>
    %23 = arith.truncf %22 : vector<8x32xf32> to vector<8x32xbf16>
    %c0_8 = arith.constant 0 : index
    %c0_9 = arith.constant 0 : index
    %c0_10 = arith.constant 0 : index
    %24 = vector.load %arg4[%c0_8, %c0_9, %c0_10] : memref<4x32x24xbf16, #tpu.memory_space<vmem>>, vector<1x32x24xbf16>
    %25 = vector.shape_cast %24 : vector<1x32x24xbf16> to vector<32x24xbf16>
    %cst_11 = arith.constant dense<0.000000e+00> : vector<8x24xf32>
    %26 = tpu.matmul %23, %25, %cst_11 {dimension_numbers = #tpu.dot_dimension_numbers<[1], [0], [0], [1], [0, 0, 1, 1], [], []>} : vector<8x32xbf16>, vector<32x24xbf16>, vector<8x24xf32> -> vector<8x24xf32>
    %27 = vector.extract_strided_slice %26 {offsets = [0, 0], sizes = [8, 8], strides = [1, 1]} : vector<8x24xf32> to vector<8x8xf32>
    %28 = arith.truncf %27 : vector<8x8xf32> to vector<8x8xbf16>
    %c0_12 = arith.constant 0 : index
    %c0_13 = arith.constant 0 : index
    %c0_14 = arith.constant 0 : index
    %c0_15 = arith.constant 0 : index
    %29 = vector.load %arg5[%c0_12, %c0_13, %c0_14, %c0_15] : memref<1x4x8x8xbf16, #tpu.memory_space<vmem>>, vector<1x1x8x8xbf16>
    %30 = vector.shape_cast %29 : vector<1x1x8x8xbf16> to vector<8x8xbf16>
    %31 = vector.shape_cast %28 : vector<8x8xbf16> to vector<1x1x8x8xbf16>
    tpu.vector_store %arg5[%c0_12, %c0_13, %c0_14, %c0_15], %31 {strides = array<i32>} : memref<1x4x8x8xbf16, #tpu.memory_space<vmem>>, vector<1x1x8x8xbf16>,
    %32 = vector.extract_strided_slice %26 {offsets = [0, 8], sizes = [8, 8], strides = [1, 1]} : vector<8x24xf32> to vector<8x8xf32>
    %33 = arith.truncf %32 : vector<8x8xf32> to vector<8x8xbf16>
    %c0_16 = arith.constant 0 : index
    %c0_17 = arith.constant 0 : index
    %c0_18 = arith.constant 0 : index
    %c0_19 = arith.constant 0 : index
    %34 = vector.load %arg6[%c0_16, %c0_17, %c0_18, %c0_19] : memref<1x4x8x8xbf16, #tpu.memory_space<vmem>>, vector<1x1x8x8xbf16>
    %35 = vector.shape_cast %34 : vector<1x1x8x8xbf16> to vector<8x8xbf16>
    %36 = vector.shape_cast %33 : vector<8x8xbf16> to vector<1x1x8x8xbf16>
    tpu.vector_store %arg6[%c0_16, %c0_17, %c0_18, %c0_19], %36 {strides = array<i32>} : memref<1x4x8x8xbf16, #tpu.memory_space<vmem>>, vector<1x1x8x8xbf16>,
    %37 = vector.extract_strided_slice %26 {offsets = [0, 16], sizes = [8, 8], strides = [1, 1]} : vector<8x24xf32> to vector<8x8xf32>
    %38 = arith.truncf %37 : vector<8x8xf32> to vector<8x8xbf16>
    %c0_20 = arith.constant 0 : index
    %c0_21 = arith.constant 0 : index
    %c0_22 = arith.constant 0 : index
    %c0_23 = arith.constant 0 : index
    %39 = vector.load %arg7[%c0_20, %c0_21, %c0_22, %c0_23] : memref<1x4x8x8xbf16, #tpu.memory_space<vmem>>, vector<1x1x8x8xbf16>
    %40 = vector.shape_cast %39 : vector<1x1x8x8xbf16> to vector<8x8xbf16>
    %41 = vector.shape_cast %38 : vector<8x8xbf16> to vector<1x1x8x8xbf16>
    tpu.vector_store %arg7[%c0_20, %c0_21, %c0_22, %c0_23], %41 {strides = array<i32>} : memref<1x4x8x8xbf16, #tpu.memory_space<vmem>>, vector<1x1x8x8xbf16>,
    %c1 = arith.constant 1 : index
    %c0_24 = arith.constant 0 : index
    %c0_25 = arith.constant 0 : index
    %42 = vector.load %arg4[%c1, %c0_24, %c0_25] : memref<4x32x24xbf16, #tpu.memory_space<vmem>>, vector<1x32x24xbf16>
    %43 = vector.shape_cast %42 : vector<1x32x24xbf16> to vector<32x24xbf16>
    %cst_26 = arith.constant dense<0.000000e+00> : vector<8x24xf32>
    %44 = tpu.matmul %23, %43, %cst_26 {dimension_numbers = #tpu.dot_dimension_numbers<[1], [0], [0], [1], [0, 0, 1, 1], [], []>} : vector<8x32xbf16>, vector<32x24xbf16>, vector<8x24xf32> -> vector<8x24xf32>
    %45 = vector.extract_strided_slice %44 {offsets = [0, 0], sizes = [8, 8], strides = [1, 1]} : vector<8x24xf32> to vector<8x8xf32>
    %46 = arith.truncf %45 : vector<8x8xf32> to vector<8x8xbf16>
    %c0_27 = arith.constant 0 : index
    %c1_28 = arith.constant 1 : index
    %c0_29 = arith.constant 0 : index
    %c0_30 = arith.constant 0 : index
    %47 = vector.load %arg5[%c0_27, %c1_28, %c0_29, %c0_30] : memref<1x4x8x8xbf16, #tpu.memory_space<vmem>>, vector<1x1x8x8xbf16>
    %48 = vector.shape_cast %47 : vector<1x1x8x8xbf16> to vector<8x8xbf16>
    %49 = vector.shape_cast %46 : vector<8x8xbf16> to vector<1x1x8x8xbf16>
    tpu.vector_store %arg5[%c0_27, %c1_28, %c0_29, %c0_30], %49 {strides = array<i32>} : memref<1x4x8x8xbf16, #tpu.memory_space<vmem>>, vector<1x1x8x8xbf16>,
    %50 = vector.extract_strided_slice %44 {offsets = [0, 8], sizes = [8, 8], strides = [1, 1]} : vector<8x24xf32> to vector<8x8xf32>
    %51 = arith.truncf %50 : vector<8x8xf32> to vector<8x8xbf16>
    %c0_31 = arith.constant 0 : index
    %c1_32 = arith.constant 1 : index
    %c0_33 = arith.constant 0 : index
    %c0_34 = arith.constant 0 : index
    %52 = vector.load %arg6[%c0_31, %c1_32, %c0_33, %c0_34] : memref<1x4x8x8xbf16, #tpu.memory_space<vmem>>, vector<1x1x8x8xbf16>
    %53 = vector.shape_cast %52 : vector<1x1x8x8xbf16> to vector<8x8xbf16>
    %54 = vector.shape_cast %51 : vector<8x8xbf16> to vector<1x1x8x8xbf16>
    tpu.vector_store %arg6[%c0_31, %c1_32, %c0_33, %c0_34], %54 {strides = array<i32>} : memref<1x4x8x8xbf16, #tpu.memory_space<vmem>>, vector<1x1x8x8xbf16>,
    %55 = vector.extract_strided_slice %44 {offsets = [0, 16], sizes = [8, 8], strides = [1, 1]} : vector<8x24xf32> to vector<8x8xf32>
    %56 = arith.truncf %55 : vector<8x8xf32> to vector<8x8xbf16>
    %c0_35 = arith.constant 0 : index
    %c1_36 = arith.constant 1 : index
    %c0_37 = arith.constant 0 : index
    %c0_38 = arith.constant 0 : index
    %57 = vector.load %arg7[%c0_35, %c1_36, %c0_37, %c0_38] : memref<1x4x8x8xbf16, #tpu.memory_space<vmem>>, vector<1x1x8x8xbf16>
    %58 = vector.shape_cast %57 : vector<1x1x8x8xbf16> to vector<8x8xbf16>
    %59 = vector.shape_cast %56 : vector<8x8xbf16> to vector<1x1x8x8xbf16>
    tpu.vector_store %arg7[%c0_35, %c1_36, %c0_37, %c0_38], %59 {strides = array<i32>} : memref<1x4x8x8xbf16, #tpu.memory_space<vmem>>, vector<1x1x8x8xbf16>,
    %c2 = arith.constant 2 : index
    %c0_39 = arith.constant 0 : index
    %c0_40 = arith.constant 0 : index
    %60 = vector.load %arg4[%c2, %c0_39, %c0_40] : memref<4x32x24xbf16, #tpu.memory_space<vmem>>, vector<1x32x24xbf16>
    %61 = vector.shape_cast %60 : vector<1x32x24xbf16> to vector<32x24xbf16>
    %cst_41 = arith.constant dense<0.000000e+00> : vector<8x24xf32>
    %62 = tpu.matmul %23, %61, %cst_41 {dimension_numbers = #tpu.dot_dimension_numbers<[1], [0], [0], [1], [0, 0, 1, 1], [], []>} : vector<8x32xbf16>, vector<32x24xbf16>, vector<8x24xf32> -> vector<8x24xf32>
    %63 = vector.extract_strided_slice %62 {offsets = [0, 0], sizes = [8, 8], strides = [1, 1]} : vector<8x24xf32> to vector<8x8xf32>
    %64 = arith.truncf %63 : vector<8x8xf32> to vector<8x8xbf16>
    %c0_42 = arith.constant 0 : index
    %c2_43 = arith.constant 2 : index
    %c0_44 = arith.constant 0 : index
    %c0_45 = arith.constant 0 : index
    %65 = vector.load %arg5[%c0_42, %c2_43, %c0_44, %c0_45] : memref<1x4x8x8xbf16, #tpu.memory_space<vmem>>, vector<1x1x8x8xbf16>
    %66 = vector.shape_cast %65 : vector<1x1x8x8xbf16> to vector<8x8xbf16>
    %67 = vector.shape_cast %64 : vector<8x8xbf16> to vector<1x1x8x8xbf16>
    tpu.vector_store %arg5[%c0_42, %c2_43, %c0_44, %c0_45], %67 {strides = array<i32>} : memref<1x4x8x8xbf16, #tpu.memory_space<vmem>>, vector<1x1x8x8xbf16>,
    %68 = vector.extract_strided_slice %62 {offsets = [0, 8], sizes = [8, 8], strides = [1, 1]} : vector<8x24xf32> to vector<8x8xf32>
    %69 = arith.truncf %68 : vector<8x8xf32> to vector<8x8xbf16>
    %c0_46 = arith.constant 0 : index
    %c2_47 = arith.constant 2 : index
    %c0_48 = arith.constant 0 : index
    %c0_49 = arith.constant 0 : index
    %70 = vector.load %arg6[%c0_46, %c2_47, %c0_48, %c0_49] : memref<1x4x8x8xbf16, #tpu.memory_space<vmem>>, vector<1x1x8x8xbf16>
    %71 = vector.shape_cast %70 : vector<1x1x8x8xbf16> to vector<8x8xbf16>
    %72 = vector.shape_cast %69 : vector<8x8xbf16> to vector<1x1x8x8xbf16>
    tpu.vector_store %arg6[%c0_46, %c2_47, %c0_48, %c0_49], %72 {strides = array<i32>} : memref<1x4x8x8xbf16, #tpu.memory_space<vmem>>, vector<1x1x8x8xbf16>,
    %73 = vector.extract_strided_slice %62 {offsets = [0, 16], sizes = [8, 8], strides = [1, 1]} : vector<8x24xf32> to vector<8x8xf32>
    %74 = arith.truncf %73 : vector<8x8xf32> to vector<8x8xbf16>
    %c0_50 = arith.constant 0 : index
    %c2_51 = arith.constant 2 : index
    %c0_52 = arith.constant 0 : index
    %c0_53 = arith.constant 0 : index
    %75 = vector.load %arg7[%c0_50, %c2_51, %c0_52, %c0_53] : memref<1x4x8x8xbf16, #tpu.memory_space<vmem>>, vector<1x1x8x8xbf16>
    %76 = vector.shape_cast %75 : vector<1x1x8x8xbf16> to vector<8x8xbf16>
    %77 = vector.shape_cast %74 : vector<8x8xbf16> to vector<1x1x8x8xbf16>
    tpu.vector_store %arg7[%c0_50, %c2_51, %c0_52, %c0_53], %77 {strides = array<i32>} : memref<1x4x8x8xbf16, #tpu.memory_space<vmem>>, vector<1x1x8x8xbf16>,
    %c3 = arith.constant 3 : index
    %c0_54 = arith.constant 0 : index
    %c0_55 = arith.constant 0 : index
    %78 = vector.load %arg4[%c3, %c0_54, %c0_55] : memref<4x32x24xbf16, #tpu.memory_space<vmem>>, vector<1x32x24xbf16>
    %79 = vector.shape_cast %78 : vector<1x32x24xbf16> to vector<32x24xbf16>
    %cst_56 = arith.constant dense<0.000000e+00> : vector<8x24xf32>
    %80 = tpu.matmul %23, %79, %cst_56 {dimension_numbers = #tpu.dot_dimension_numbers<[1], [0], [0], [1], [0, 0, 1, 1], [], []>} : vector<8x32xbf16>, vector<32x24xbf16>, vector<8x24xf32> -> vector<8x24xf32>
    %81 = vector.extract_strided_slice %80 {offsets = [0, 0], sizes = [8, 8], strides = [1, 1]} : vector<8x24xf32> to vector<8x8xf32>
    %82 = arith.truncf %81 : vector<8x8xf32> to vector<8x8xbf16>
    %c0_57 = arith.constant 0 : index
    %c3_58 = arith.constant 3 : index
    %c0_59 = arith.constant 0 : index
    %c0_60 = arith.constant 0 : index
    %83 = vector.load %arg5[%c0_57, %c3_58, %c0_59, %c0_60] : memref<1x4x8x8xbf16, #tpu.memory_space<vmem>>, vector<1x1x8x8xbf16>
    %84 = vector.shape_cast %83 : vector<1x1x8x8xbf16> to vector<8x8xbf16>
    %85 = vector.shape_cast %82 : vector<8x8xbf16> to vector<1x1x8x8xbf16>
    tpu.vector_store %arg5[%c0_57, %c3_58, %c0_59, %c0_60], %85 {strides = array<i32>} : memref<1x4x8x8xbf16, #tpu.memory_space<vmem>>, vector<1x1x8x8xbf16>,
    %86 = vector.extract_strided_slice %80 {offsets = [0, 8], sizes = [8, 8], strides = [1, 1]} : vector<8x24xf32> to vector<8x8xf32>
    %87 = arith.truncf %86 : vector<8x8xf32> to vector<8x8xbf16>
    %c0_61 = arith.constant 0 : index
    %c3_62 = arith.constant 3 : index
    %c0_63 = arith.constant 0 : index
    %c0_64 = arith.constant 0 : index
    %88 = vector.load %arg6[%c0_61, %c3_62, %c0_63, %c0_64] : memref<1x4x8x8xbf16, #tpu.memory_space<vmem>>, vector<1x1x8x8xbf16>
    %89 = vector.shape_cast %88 : vector<1x1x8x8xbf16> to vector<8x8xbf16>
    %90 = vector.shape_cast %87 : vector<8x8xbf16> to vector<1x1x8x8xbf16>
    tpu.vector_store %arg6[%c0_61, %c3_62, %c0_63, %c0_64], %90 {strides = array<i32>} : memref<1x4x8x8xbf16, #tpu.memory_space<vmem>>, vector<1x1x8x8xbf16>,
    %91 = vector.extract_strided_slice %80 {offsets = [0, 16], sizes = [8, 8], strides = [1, 1]} : vector<8x24xf32> to vector<8x8xf32>
    %92 = arith.truncf %91 : vector<8x8xf32> to vector<8x8xbf16>
    %c0_65 = arith.constant 0 : index
    %c3_66 = arith.constant 3 : index
    %c0_67 = arith.constant 0 : index
    %c0_68 = arith.constant 0 : index
    %93 = vector.load %arg7[%c0_65, %c3_66, %c0_67, %c0_68] : memref<1x4x8x8xbf16, #tpu.memory_space<vmem>>, vector<1x1x8x8xbf16>
    %94 = vector.shape_cast %93 : vector<1x1x8x8xbf16> to vector<8x8xbf16>
    %95 = vector.shape_cast %92 : vector<8x8xbf16> to vector<1x1x8x8xbf16>
    tpu.vector_store %arg7[%c0_65, %c3_66, %c0_67, %c0_68], %95 {strides = array<i32>} : memref<1x4x8x8xbf16, #tpu.memory_space<vmem>>, vector<1x1x8x8xbf16>,
    return
  }
  func.func @transform_0(%arg0: i32, %arg1: i32) -> (i32, i32, i32) {
    %c0_i32 = arith.constant 0 : i32
    %c0_i32_0 = arith.constant 0 : i32
    return %arg0, %arg1, %c0_i32 : i32, i32, i32
  }
  func.func @transform_1(%arg0: i32, %arg1: i32) -> (i32, i32) {
    %c0_i32 = arith.constant 0 : i32
    %c0_i32_0 = arith.constant 0 : i32
    %c0_i32_1 = arith.constant 0 : i32
    return %c0_i32, %c0_i32_0 : i32, i32
  }
  func.func @transform_2(%arg0: i32, %arg1: i32) -> (i32, i32, i32) {
    %c0_i32 = arith.constant 0 : i32
    %c0_i32_0 = arith.constant 0 : i32
    %c0_i32_1 = arith.constant 0 : i32
    %c0_i32_2 = arith.constant 0 : i32
    return %c0_i32, %c0_i32_0, %c0_i32_1 : i32, i32, i32
  }
  func.func @transform_3(%arg0: i32, %arg1: i32) -> (i32, i32, i32, i32) {
    %c0_i32 = arith.constant 0 : i32
    %c0_i32_0 = arith.constant 0 : i32
    %c0_i32_1 = arith.constant 0 : i32
    return %arg0, %c0_i32, %arg1, %c0_i32_0 : i32, i32, i32, i32
  }
  func.func @transform_4(%arg0: i32, %arg1: i32) -> (i32, i32, i32, i32) {
    %c0_i32 = arith.constant 0 : i32
    %c0_i32_0 = arith.constant 0 : i32
    %c0_i32_1 = arith.constant 0 : i32
    return %arg0, %c0_i32, %arg1, %c0_i32_0 : i32, i32, i32, i32
  }
  func.func @transform_5(%arg0: i32, %arg1: i32) -> (i32, i32, i32, i32) {
    %c0_i32 = arith.constant 0 : i32
    %c0_i32_0 = arith.constant 0 : i32
    %c0_i32_1 = arith.constant 0 : i32
    return %arg0, %c0_i32, %arg1, %c0_i32_0 : i32, i32, i32, i32
  }
}

</mosaic_0001>

<bundles_post_ra>
// kernel: tpu_custom_call.1
= control target key start
LH: loop header
LB: loop body
LE: loop exit
PB: predicated region body
PF: predicated region fallthrough
CT: control target
= control target key end

     0   :  { %11 = vsyncpa [#allocation3], 0  ;;  %s1426_s0 = inlined_call_operand.vmem [shape: f32[2,8,32], index: 0, kind: input, shape index: {}]   ;;  %s1427_s1 = inlined_call_operand.vmem [shape: f32[1,32], index: 1, kind: input, shape index: {}]   ;;  %s1428_s2 = inlined_call_operand.vmem [shape: bf16[4,32,24], index: 2, kind: input, shape index: {}]   ;;  %s1429_s3 = inlined_call_operand.hbm [shape: bf16[2,4,8,8], index: 3, kind: output, shape index: {0}]   ;;  %s1430_s4 = inlined_call_operand.hbm [shape: bf16[2,4,8,8], index: 4, kind: output, shape index: {1}]   ;;  %s1431_s5 = inlined_call_operand.hbm [shape: bf16[2,4,8,8], index: 5, kind: output, shape index: {2}]  }
   0x1   :  { %13 = vsyncpa [#allocation3 + $0x1], 0 }
   0x2   :  { %14 = vsyncpa [#allocation5], 0 }
   0x3   :  { %16 = vsyncpa [#allocation5 + $0x1], 0  ;;  %s1153_s18 = smov 0   ;;  %s1155_s19 = smov 0  }
   0x4   :  { %s1157_s20 = smov 0   ;;  %s1159_s21 = smov 0  }
   0x5   :  { %s1161_s22 = smov 0   ;;  %s1163_s23 = smov 0  }
   0x6 LB: > { %s784_s24 = sadd.s32 4294967295, %s1112_s23   ;;  %s1432_s25 = sadd.s32 4294967294, %s1112_s23   ;;  %s1112_s23 = sphi %s1163_s23, %s22_s23   ;;  %s1108_s22 = sphi %s1161_s22, %s1440_s22   ;;  %s1104_s21 = sphi %s1159_s21, %s1439_s21   ;;  %s1100_s20 = sphi %s1157_s20, %s1438_s20   ;;  %s1096_s19 = sphi %s1155_s19, %s1437_s19   ;;  %s1092_s18 = sphi %s1153_s18, %s1436_s18  }
   0x7   : > { %s34_s26 = sadd.s32 1, %s1108_s22  ;;  %s113_s27 = sadd.s32 1, %s1100_s20 }
   0x8   : > { %p36_p0 = scmp.ge.s32.totalorder %s34_s26, 2  ;;  %p123_p1 = scmp.ne.s32.totalorder %s1100_s20, %s1096_s19 }
   0x9   : > { %p124_p2 = scmp.eq.s32.totalorder %s784_s24, 1  ;;  %p129_p3 = scmp.ne.s32.totalorder %s1096_s19, %s1092_s18 }
   0xa   : > { %s1442_s26 = smov (%p36_p0, %s34_s26), 0  ;;  %p130_p5 = scmp.eq.s32.totalorder %s1432_s25, 1 }
   0xb   : > { %p1195_p4 = por %p124_p2, %p123_p1  ;;  %s108_s29 = ssub.s32 %s1108_s22, %s1442_s26 }
   0xc   : > { %p788_p6 = scmp.ge.s32.totalorder %s1112_s23, 1  ;;  %p111_p7 = scmp.eq.s32.totalorder %s108_s29, 0 }
   0xd   : > { %p1204_p8 = por %p130_p5, %p129_p3  ;;  %p220_p9 = scmp.lt.s32.totalorder %s1112_s23, 3 }
   0xe   : > { %s1210_s6 = scalar_select %p111_p7, %s1100_s20, %s113_s27  }
   0xf   : > { %p221_p10 = pnand %p788_p6, %p220_p9 }
  0x10   : > { %p260_p11 = scmp.lt.s32.totalorder (!%p221_p10), %s1104_s21, 1  ;;  %vm270_vm0 = vcmask (!%p221_p10), 261120   ;;  %v964_v7 = vld [vmem:[%s1428_s2] sm:$0xff] (!%p221_p10)   ;;  %v965_v8 = vld [vmem:[%s1428_s2 + $0x10] sm:$0xff] (!%p221_p10)   ;;  %v1114_v9 = vmov (!%p221_p10), 0.0   ;;  %v966_v10 = vld [vmem:[%s1428_s2 + $0x8] sm:$0xff] (!%p221_p10)  }
  0x11   : > { %224 = sbr.rel (%p221_p10) target bundleno = 736 (0x2e0), region = 32  ;;  %861 = vmatprep.subr.bf16.mxu0 (!%p221_p10), %v1114_v9  ;;  %869 = vmatprep.subr.bf16.mxu1 (!%p221_p10), %v1114_v9  ;;  %v967_v11 = vld [vmem:[%s1428_s2 + $0x18] sm:$0xff] (!%p221_p10)   ;;  %vm1115_vm1 = vmmov (!%p221_p10), 0   ;;  %v793_v16 = vld [vmem:[%s1427_s1] ss:$0 sm:$0xff] (!%p221_p10)  ;;  %v969_v20 = vld [vmem:[%s1428_s2 + $0x30] sm:$0xff] (!%p221_p10)  }
  0x12   : > { %862 = vmatpush3.bf16.msra.mxu0 (!%p221_p10), %v964_v7  ;;  %870 = vmatpush3.bf16.msra.mxu1 (!%p221_p10), %v965_v8  ;;  %v968_v19 = vld [vmem:[%s1428_s2 + $0x20] sm:$0xff] (!%p221_p10)   ;;  %v970_v22 = vld [vmem:[%s1428_s2 + $0x28] sm:$0xff] (!%p221_p10)   ;;  %v971_v23 = vld [vmem:[%s1428_s2 + $0x38] sm:$0xff] (!%p221_p10)   ;;  %s243_s17 = sand.u32 (!%p221_p10), 1, %s1096_s19   ;;  %vm353_vm2 = vcmask (!%p221_p10), 60416   ;;  %s1117_s9 = smov (!%p221_p10), 112  }
  0x13   : > { %863 = vmatprep.subr.bf16.mxu0 (!%p221_p10), %v1114_v9  ;;  %871 = vmatprep.subr.bf16.mxu1 (!%p221_p10), %v1114_v9  ;;  %s1257_s27 = sshll.u32 (!%p221_p10), %s243_s17, 4  ;;  %s1269_s10 = sshll.u32 (!%p221_p10), %s1104_s21, 8 }
  0x14   : > { %865 = vmatprep.mubr.msk.bf16.mxu0 (!%p221_p10), %vm1115_vm1, %v1114_v9  ;;  %873 = vmatprep.mubr.msk.bf16.mxu1 (!%p221_p10), %vm1115_vm1, %v1114_v9  ;;  %s245_s29 = scalar_lea.vmem (!%p221_p10), [#allocation2], %s1257_s27  ;;  %s1278_s13 = scalar_lea.hbm (!%p221_p10), %s1429_s3, %s1269_s10 }
  0x15   : > { %s1282_s14 = scalar_lea.sflag (!%p221_p10), [#allocation3], %s243_s17 }
  0x16   : > { %864 = vmatpush3.bf16.msra.mxu0 (!%p221_p10), %v966_v10  ;;  %872 = vmatpush3.bf16.msra.mxu1 (!%p221_p10), %v967_v11 }
  0x17   : > { %877 = vmatprep.subr.bf16.mxu0 (!%p221_p10), %v1114_v9  ;;  %885 = vmatprep.subr.bf16.mxu1 (!%p221_p10), %v1114_v9 }
  0x18   : > { %s261_s7 = scalar_select %p260_p11, %s1104_s21, 1 }
  0x19   : > { %s1118_s21 = smov [#allocation2]  }
  0x1a   : > { %s792_s8 = sshll.u32 %s261_s7, 3  ;;  %s1116_s7 = smov 120  }
  0x1b   : > { %s266_s11 = scalar_lea.vmem %s1426_s0, %s792_s8  ;;  %s610_s8 = sshll.u32 %s245_s29, 4  ;;  %s1271_s8 = int_to_ptr.vmem [resolvable:$true] %s610_s8 }
  0x1c   : > { %v268_v0 = vld [vmem:[%s266_s11] sm:$0xff]  ;;  %s974_s15 = scalar_lea.vmem %s1271_s8, 256  ;;  %s978_s16 = sshll.u32 %s1118_s21, 4  ;;  %s979_s16 = int_to_ptr.vmem [resolvable:$false] %s978_s16 }
  0x1d   : > { %v271_v1 = vsel %vm270_vm0, %v268_v0, 0.0  ;;  %p975_p12 = scmp.ne.s32.totalorder %s1271_s8, %s974_s15  ;;  %p981_p1 = scmp.lt.s32.totalorder %s1271_s8, %s979_s16 }
  0x1e   : > { %272 = vadd.xlane.f32.xlu0 %v271_v1 }
  0x1f   : > { %p976_p13 = pnand %p975_p12, %p1195_p4 }
  0x21   : > { %p977_p0 = pneg %p976_p13 }
  0xab   : > { %v273_v2 = vpop.xlane.xlu0 %272 }
  0xac   : > { %v275_v3 = vmul.f32 0.03125, %v273_v2 }
  0xae   : > { %v276_v4 = vsub.f32 %v268_v0, %v275_v3 }
  0xb0   : > { %v277_v5 = vmul.f32 %v276_v4, %v276_v4 }
  0xb2   : > { %v278_v6 = vsel %vm270_vm0, %v277_v5, 0.0 }
  0xb3   : > { %279 = vadd.xlane.f32.xlu0 %v278_v6 }
 0x140   : > { %v280_v12 = vpop.xlane.xlu0 %279 }
 0x141   : > { %v281_v13 = vmul.f32 0.03125, %v280_v12 }
 0x143   : > { %v282_v14 = vadd.f32 1e-05, %v281_v13 }
 0x145   : > { %972 = vrsqrt.f32 %v282_v14 }
 0x14f   : > { %v973_v15 = vpop.eup %972 }
 0x150   : > { %v284_v17 = vmul.f32 %v973_v15, %v276_v4 }
 0x152   : > { %v291_v18 = vmul.f32 %v793_v16, %v284_v17 }
 0x154   : > { %v292_v21 = vpack.c.bf16 %v291_v18, %v291_v18 }
 0x156   : > { %866 = vmatmul.mubr.msk.bf16.vlgmr.msra.gmra.mrb[0].mxu0 %vm270_vm0, %v292_v21  ;;  %874 = vmatmul.mubr.msk.bf16.vlgmr.msra.gmra.mrb[0].mxu1 %vm270_vm0, %v292_v21 }
 0x157   : > { %878 = vmatpush3.bf16.msra.mxu0 %v968_v19  ;;  %886 = vmatpush3.bf16.msra.mxu1 %v969_v20 }
 0x158   : > { %879 = vmatprep.subr.bf16.mxu0 %v1114_v9  ;;  %887 = vmatprep.subr.bf16.mxu1 %v1114_v9 }
 0x159   : > { %881 = vmatprep.mubr.msk.bf16.mxu0 %vm1115_vm1, %v1114_v9  ;;  %889 = vmatprep.mubr.msk.bf16.mxu1 %vm1115_vm1, %v1114_v9 }
 0x15b   : > { %880 = vmatpush3.bf16.msra.mxu0 %v970_v22  ;;  %888 = vmatpush3.bf16.msra.mxu1 %v971_v23 }
 0x15e   : > { %882 = vmatmul.mubr.msk.bf16.vlgmr.msra.gmra.mrb[4].mxu0 %vm270_vm0, %v292_v21  ;;  %890 = vmatmul.mubr.msk.bf16.vlgmr.msra.gmra.mrb[4].mxu1 %vm270_vm0, %v292_v21 }
 0x229   : > { %v346_v24 = vpop.f32.mrb[0].mxu0  ;;  %v417_v25 = vpop.f32.mrb[0].mxu1 }
 0x22a   : > { %v352_v26 = vpack.c.bf16 %v346_v24, %v346_v24  ;;  %v423_v27 = vpack.c.bf16 %v417_v25, %v417_v25  ;;  %v867_v28 = vpop.f32.mrb[1].mxu0  ;;  %v875_v29 = vpop.f32.mrb[1].mxu1 }
 0x22b   : > { %v349_v30 = vpop.f32.mrb[2].mxu0  ;;  %v420_v31 = vpop.f32.mrb[2].mxu1 }
 0x22c   : > { %354 = vst.msk [vmem:[%s245_s29] sm:$0xf] %vm353_vm2, %v352_v26  ;;  %805 = vst.msk [vmem:[%s245_s29 + $0x4] sm:$0xf] %vm353_vm2, %v423_v27  ;;  %v876_v32 = vpop.f32.mrb[3].mxu1  ;;  %358 = vrot.lane.b32.xlu1 %v352_v26, %s1116_s7  ;;  %v868_v33 = vpop.f32.mrb[3].mxu0 }
 0x230   : > { %429 = vrot.lane.b32.xlu1 %v423_v27, %s1116_s7 }
 0x231   : > { %v490_v34 = vpop.f32.mrb[4].mxu0  ;;  %v563_v35 = vpop.f32.mrb[4].mxu1 }
 0x232   : > { %v496_v36 = vpack.c.bf16 %v490_v34, %v490_v34  ;;  %v569_v37 = vpack.c.bf16 %v563_v35, %v563_v35  ;;  %v883_v38 = vpop.f32.mrb[5].mxu0  ;;  %v891_v39 = vpop.f32.mrb[5].mxu1 }
 0x233   : > { %v493_v40 = vpop.f32.mrb[6].mxu0  ;;  %v566_v41 = vpop.f32.mrb[6].mxu1 }
 0x234   : > { %816 = vst.msk [vmem:[%s245_s29 + $0x8] sm:$0xf] %vm353_vm2, %v496_v36  ;;  %827 = vst.msk [vmem:[%s245_s29 + $0xc] sm:$0xf] %vm353_vm2, %v569_v37  ;;  %v892_v42 = vpop.f32.mrb[7].mxu1  ;;  %362 = vrot.lane.b32.xlu1 %v352_v26, %s1117_s9  ;;  %502 = vrot.lane.b32.xlu0 %v496_v36, %s1116_s7  ;;  %v884_v43 = vpop.f32.mrb[7].mxu0 }
 0x235   : > { %s980_s29 = scalar_lea.vmem %s979_s16, 512 }
 0x236   : > { %p982_p2 = scmp.lt.s32.totalorder %s980_s29, %s974_s15 }
 0x238   : > { %434 = vrot.lane.b32.xlu1 %v423_v27, %s1117_s9  ;;  %p983_p3 = por %p982_p2, %p981_p1 }
 0x23a   : > { %p984_p5 = pnand %p983_p3, %p977_p0 }
 0x23c   : > { %987 = shalt.err (!%p984_p5)
}
 0x23d   : > { %s988_s17 = scalar_lea.hbm %s1278_s13, 256  ;;  %s992_s21 = scalar_lea.hbm %s1429_s3, 512 }
 0x23e   : > { %p989_p6 = scmp.ne.s32.totalorder %s1278_s13, %s988_s17  ;;  %p993_p10 = scmp.lt.u32.totalorder %s1278_s13, %s1429_s3 }
 0x23f   : > { %p994_p11 = scmp.lt.u32.totalorder %s992_s21, %s988_s17  ;;  %p996_p13 = scmp.lt.u32.totalorder %s988_s17, %s1278_s13 }
 0x240   : > { %p990_p7 = pnand %p989_p6, %p1195_p4 }
 0x241   : > { %p995_p12 = por %p994_p11, %p993_p10 }
 0x242   : > { %p991_p9 = pneg %p990_p7 }
 0x243   : > { %p997_p0 = por %p996_p13, %p995_p12 }
 0x245   : > { %p998_p1 = pnand %p997_p0, %p991_p9 }
 0x247   : > { %1001 = shalt.err (!%p998_p1)
}
 0x248   : > { %s1119_s15 = smov 64   ;;  %s1120_s29 = smov 4   ;;  %575 = vrot.lane.b32.xlu1 %v569_v37, %s1116_s7 }
 0x249   : > { %893 = dma.vmem_to_hbm [thread:$0]  (%p1195_p4), %s1271_s8, 256, %s1278_s13, %s1282_s14, %s1119_s15, %s1119_s15, %s1120_s29  }
 0x24a   : > { %s252_s25 = scalar_lea.vmem [#allocation4], %s1257_s27  ;;  %s1316_s17 = scalar_lea.vmem [#allocation6], %s1257_s27 }
 0x24b   : > { %s627_s7 = sshll.u32 %s252_s25, 4  ;;  %s1323_s8 = sand.u32 1, %s784_s24   ;;  %s1327_s7 = int_to_ptr.vmem [resolvable:$true] %s627_s7 }
 0x24c   : > { %507 = vrot.lane.b32.xlu1 %v496_v36, %s1117_s9  ;;  %s1333_s27 = scalar_lea.hbm %s1430_s4, %s1269_s10  ;;  %s591_s14 = scalar_lea.sflag [#allocation5], %s1323_s8 }
 0x24d   : > { %s1002_s11 = scalar_lea.vmem %s1327_s7, 256  ;;  %s1121_s24 = smov [#allocation4]  }
 0x24e   : > { %p1003_p2 = scmp.ne.s32.totalorder %s1327_s7, %s1002_s11  ;;  %s1006_s12 = sshll.u32 %s1121_s24, 4  ;;  %s1007_s12 = int_to_ptr.vmem [resolvable:$false] %s1006_s12 }
 0x24f   : > { %s1008_s21 = scalar_lea.vmem %s1007_s12, 512  ;;  %p1009_p6 = scmp.lt.s32.totalorder %s1327_s7, %s1007_s12 }
 0x250   : > { %580 = vrot.lane.b32.xlu1 %v569_v37, %s1117_s9  ;;  %p1004_p3 = pnand %p1003_p2, %p1195_p4  ;;  %p1010_p7 = scmp.lt.s32.totalorder %s1008_s21, %s1002_s11 }
 0x252   : > { %p1005_p5 = pneg %p1004_p3  ;;  %p1011_p9 = por %p1010_p7, %p1009_p6 }
 0x254   : > { %p1012_p10 = pnand %p1011_p9, %p1005_p5 }
 0x29e   : > { %v359_v44 = vpop.permute.xlu1 %358 }
 0x29f   : > { %361 = vst.msk [vmem:[%s252_s25] sm:$0xf] %vm353_vm2, %v359_v44 }
 0x2a2   : > { %v430_v45 = vpop.permute.xlu1 %429 }
 0x2a3   : > { %807 = vst.msk [vmem:[%s252_s25 + $0x4] sm:$0xf] %vm353_vm2, %v430_v45 }
 0x2a6   : > { %v363_v46 = vpop.permute.xlu1 %362  ;;  %v503_v47 = vpop.permute.xlu0 %502 }
 0x2a7   : > { %365 = vst.msk [vmem:[%s1316_s17] sm:$0xf] %vm353_vm2, %v363_v46  ;;  %818 = vst.msk [vmem:[%s252_s25 + $0x8] sm:$0xf] %vm353_vm2, %v503_v47 }
 0x2aa   : > { %v435_v48 = vpop.permute.xlu1 %434 }
 0x2ab   : > { %808 = vst.msk [vmem:[%s1316_s17 + $0x4] sm:$0xf] %vm353_vm2, %v435_v48 }
 0x2ba   : > { %v576_v49 = vpop.permute.xlu1 %575 }
 0x2bb   : > { %829 = vst.msk [vmem:[%s252_s25 + $0xc] sm:$0xf] %vm353_vm2, %v576_v49 }
 0x2bc   : > { %1015 = shalt.err (!%p1012_p10)
}
 0x2bd   : > { %s1016_s16 = scalar_lea.hbm %s1333_s27, 256  ;;  %s1020_s13 = scalar_lea.hbm %s1430_s4, 512 }
 0x2be   : > { %p1017_p11 = scmp.ne.s32.totalorder %s1333_s27, %s1016_s16  ;;  %p1021_p0 = scmp.lt.u32.totalorder %s1333_s27, %s1430_s4 }
 0x2bf   : > { %p1022_p1 = scmp.lt.u32.totalorder %s1020_s13, %s1016_s16  ;;  %p1024_p3 = scmp.lt.u32.totalorder %s1016_s16, %s1333_s27 }
 0x2c0   : > { %p1018_p12 = pnand %p1017_p11, %p1195_p4 }
 0x2c1   : > { %p1023_p2 = por %p1022_p1, %p1021_p0 }
 0x2c2   : > { %p1019_p13 = pneg %p1018_p12 }
 0x2c3   : > { %p1025_p5 = por %p1024_p3, %p1023_p2 }
 0x2c5   : > { %p1026_p6 = pnand %p1025_p5, %p1019_p13 }
 0x2c7   : > { %1029 = shalt.err (!%p1026_p6)
}
 0x2c8   : > { %894 = dma.vmem_to_hbm [thread:$0]  (%p1195_p4), %s1327_s7, 256, %s1333_s27, %s591_s14, %s1119_s15, %s1119_s15, %s1120_s29   ;;  %v508_v50 = vpop.permute.xlu1 %507 }
 0x2c9   : > { %s644_s11 = sshll.u32 %s1316_s17, 4  ;;  %819 = vst.msk [vmem:[%s1316_s17 + $0x8] sm:$0xf] %vm353_vm2, %v508_v50  ;;  %s1372_s25 = scalar_lea.hbm %s1431_s5, %s1269_s10  ;;  %s1366_s11 = int_to_ptr.vmem [resolvable:$true] %s644_s11 }
 0x2ca   : > { %s1030_s9 = scalar_lea.vmem %s1366_s11, 256  ;;  %s1122_s7 = smov [#allocation6]  }
 0x2cb   : > { %p1031_p7 = scmp.ne.s32.totalorder %s1366_s11, %s1030_s9  ;;  %s1034_s27 = sshll.u32 %s1122_s7, 4  ;;  %s1035_s27 = int_to_ptr.vmem [resolvable:$false] %s1034_s27 }
 0x2cc   : > { %v581_v51 = vpop.permute.xlu1 %580  ;;  %s1036_s13 = scalar_lea.vmem %s1035_s27, 512  ;;  %p1037_p11 = scmp.lt.s32.totalorder %s1366_s11, %s1035_s27 }
 0x2cd   : > { %830 = vst.msk [vmem:[%s1316_s17 + $0xc] sm:$0xf] %vm353_vm2, %v581_v51  ;;  %p1032_p9 = pnand %p1031_p7, %p1195_p4  ;;  %p1038_p12 = scmp.lt.s32.totalorder %s1036_s13, %s1030_s9 }
 0x2cf   : > { %p1033_p10 = pneg %p1032_p9  ;;  %p1039_p13 = por %p1038_p12, %p1037_p11 }
 0x2d1   : > { %p1040_p0 = pnand %p1039_p13, %p1033_p10 }
 0x2d3   : > { %1043 = shalt.err (!%p1040_p0)
}
 0x2d4   : > { %s1044_s10 = scalar_lea.hbm %s1372_s25, 256  ;;  %s1048_s12 = scalar_lea.hbm %s1431_s5, 512 }
 0x2d5   : > { %p1045_p1 = scmp.ne.s32.totalorder %s1372_s25, %s1044_s10  ;;  %p1049_p5 = scmp.lt.u32.totalorder %s1372_s25, %s1431_s5 }
 0x2d6   : > { %p1050_p6 = scmp.lt.u32.totalorder %s1048_s12, %s1044_s10  ;;  %p1052_p9 = scmp.lt.u32.totalorder %s1044_s10, %s1372_s25 }
 0x2d7   : > { %p1046_p2 = pnand %p1045_p1, %p1195_p4 }
 0x2d8   : > { %p1051_p7 = por %p1050_p6, %p1049_p5 }
 0x2d9   : > { %p1047_p3 = pneg %p1046_p2 }
 0x2da   : > { %p1053_p10 = por %p1052_p9, %p1051_p7 }
 0x2dc   : > { %p1054_p11 = pnand %p1053_p10, %p1047_p3 }
 0x2de   : > { %1057 = shalt.err (!%p1054_p11)
}
 0x2df   : > { %895 = dma.vmem_to_hbm [thread:$0]  (%p1195_p4), %s1366_s11, 256, %s1372_s25, %s591_s14, %s1119_s15, %s1119_s15, %s1120_s29  }
 0x2e0 PF: > { %p909_p12 = scmp.ge.s32.totalorder %s1112_s23, 2  ;;  %s659_s9 = sand.u32 1, %s1092_s18  }
 0x2e1   : > { %s660_s7 = scalar_lea.sflag [#allocation3], %s659_s9 }
 0x2e2   : > { %p900_p13 = pnand %p909_p12, %p1204_p8 }
 0x2e4   : > { %1083 = dma.done.wait (!%p900_p13), %s660_s7, 256  }
 0x2e5   : > { %1085 = vsyncadd (!%p900_p13), %s660_s7, 4294967040  ;;  %s1435_s28 = sadd.s32 4294967294, %s1112_s23  }
 0x2e6   : > { %s668_s27 = sand.u32 1, %s1435_s28  }
 0x2e7   : > { %s669_s13 = scalar_lea.sflag [#allocation5], %s668_s27 }
 0x2e8   : > { %1087 = dma.done.wait (!%p900_p13), %s669_s13, 512  }
 0x2e9   : > { %1089 = vsyncadd (!%p900_p13), %s669_s13, 4294966784  ;;  %s22_s23 = sadd.s32 1, %s1112_s23   ;;  %s1436_s18 = smov %s1096_s19 }
 0x2ea   : > { %p19_p4 = scmp.ge.s32.totalorder %s22_s23, 4   ;;  %s1437_s19 = smov %s1100_s20 }
 0x2eb   : > { %s1438_s20 = smov %s1210_s6  ;;  %s1439_s21 = smov %s1108_s22 }
 0x2ec   : > { %s1440_s22 = smov %s1442_s26  ;;  %21 = sbr.rel (!%p19_p4) target bundleno = 6 (0x6), region = 111 }
 0x2f3   :  { %683 = vsyncpa [#allocation3], 1 }
 0x2f4   :  { %685 = vsyncpa [#allocation3 + $0x1], 1 }
 0x2f5   :  { %686 = vsyncpa [#allocation5], 1 }
 0x2f6   :  { %688 = vsyncpa [#allocation5 + $0x1], 1 }

</bundles_post_ra>
